<compile_context>
chip_gen: v5e
topology: v5e:2x2
jax: 0.10.0
libtpu: 0.0.40
codegen_flags: <defaults>
</compile_context>

<pallas_src>
import math

import jax
import jax.numpy as jnp
from jax import lax
from jax.experimental import pallas as pl
from jax.experimental.pallas import tpu as pltpu


def _round_up(a, m):
    return ((a + m - 1) // m) * m


def _cdiv(a, b):
    return (a + b - 1) // b


def _vmem_capacity_bytes():
    """Physical VMEM per TensorCore; conservative 64 MiB (v7x) fallback."""
    try:
        return int(pltpu.get_tpu_info().vmem_capacity_bytes)
    except Exception:
        return 64 * 1024 * 1024


def _working_set_bytes(tm, tn, tk, in_bytes, out_bytes):
    # 2x double-buffered inputs (x, W, bias) + 2x output blocks + f32 accumulator.
    return (2 * (tm * tk + tn * tk + tn) * in_bytes
            + 2 * tm * tn * out_bytes
            + tm * tn * 4)


def _linear_kernel(x_ref, w_ref, b_ref, o_ref, acc_ref):
    """One (TM, TN) output tile of x @ W^T + b, accumulated over the K grid axis.

    x_ref:   (TM, TK)  activation tile (compute dtype, e.g. bf16)
    w_ref:   (TN, TK)  weight tile in its original [num_classes, d_model] layout
    b_ref:   (1,  TN)  bias row (f32)
    o_ref:   (TM, TN)  output tile (x.dtype)
    acc_ref: (TM, TN)  f32 VMEM accumulator
    """
    k = pl.program_id(2)

    @pl.when(k == 0)
    def _():
        # Fold the bias into the accumulator init instead of an epilogue add.
        acc_ref[...] = jnp.broadcast_to(
            b_ref[...].astype(jnp.float32), acc_ref.shape)

    # MXU matmul contracting the last dim of both operands (x @ W^T) with f32
    # accumulation; avoids any wrapper-side transpose of the weight.
    acc_ref[...] += lax.dot_general(
        x_ref[...], w_ref[...],
        dimension_numbers=(((1,), (1,)), ((), ())),
        preferred_element_type=jnp.float32)

    @pl.when(k == pl.num_programs(2) - 1)
    def _():
        o_ref[...] = acc_ref[...].astype(o_ref.dtype)


def classifier_forward(x, weight, bias, *,
                       tm=1024, tn=2048, tk=1024,
                       compute_dtype=jnp.bfloat16):
    """x: [B, d_model], weight: [num_classes, d_model], bias: [num_classes].

    Returns [B, num_classes] = x @ weight.T + bias (nn.Linear semantics).
    """
    B, K = x.shape
    C = weight.shape[0]
    out_dtype = x.dtype

    # --- bf16 MXU operands; accumulation stays f32 inside the kernel. ---
    x_c = x.astype(compute_dtype)
    w_c = weight.astype(compute_dtype)          # kept in native [C, K] layout
    b2 = bias.astype(jnp.float32).reshape(1, C)

    in_bytes = jnp.dtype(compute_dtype).itemsize
    out_bytes = jnp.dtype(out_dtype).itemsize
    sub = 16 if in_bytes == 2 else (32 if in_bytes == 1 else 8)

    # Normalise user-provided tile caps to hardware granules.
    tm = max(sub, _round_up(tm, sub))
    tn = max(128, _round_up(tn, 128))
    tk = max(128, _round_up(tk, 128))

    # --- VMEM budget (generation aware): ~48 MiB limit on v7x, ~96 MiB v5e/v6e.
    vmem_cap = _vmem_capacity_bytes()
    vmem_limit = min(vmem_cap * 3 // 4, 100 * 1024 * 1024)
    budget = vmem_limit - (2 << 20)

    # --- K tiling: must cover K exactly (pad only when unavoidable). ---
    if K <= tk:
        tk_eff, K_pad = K, K                    # single full-dim K block, no pad
    else:
        tk_eff, K_pad = None, K
        if K % 128 == 0:
            for cand in range(tk, 127, -128):   # largest 128-multiple divisor
                if K % cand == 0:
                    tk_eff = cand
                    break
        if tk_eff is None:                      # rare: K not tileable exactly
            tk_eff = tk
            K_pad = _round_up(K, tk_eff)

    # --- M/N tiling: full-dim tiles when they fit (streams the weight once for
    #     small/moderate B); otherwise the largest cap-sized tile. ---
    tm_eff = B if B <= tm else tm
    tn_eff = C if C <= tn else tn

    # Shrink to the VMEM budget: K first, then N, then M.
    while _working_set_bytes(tm_eff, tn_eff, tk_eff, in_bytes, out_bytes) > budget:
        half_k = tk_eff // 2
        if tk_eff >= 256 and half_k % 128 == 0 and K_pad % half_k == 0:
            tk_eff = half_k
        elif tn_eff >= 256:
            tn_eff = _round_up(tn_eff // 2, 128)
        elif tm_eff >= 2 * sub:
            tm_eff = _round_up(tm_eff // 2, sub)
        else:
            break

    # --- v7x megacore: ensure >=2 parallel (i, j) tiles when the problem allows.
    if _cdiv(B, tm_eff) * _cdiv(C, tn_eff) < 2:
        if _cdiv(C, 128) >= 2:
            tn_eff = _round_up(_cdiv(C, 2), 128)
        elif _cdiv(B, sub) >= 2:
            tm_eff = _round_up(_cdiv(B, 2), sub)

    grid = (_cdiv(B, tm_eff), _cdiv(C, tn_eff), K_pad // tk_eff)

    # Pad only the K axis, and only when it cannot be tiled exactly (zeros are
    # exact for the contraction).  M/N boundary blocks need no HBM padding:
    # their garbage only reaches output rows/cols that are never stored.
    if K_pad != K:
        x_c = jnp.pad(x_c, ((0, 0), (0, K_pad - K)))
        w_c = jnp.pad(w_c, ((0, 0), (0, K_pad - K)))

    out = pl.pallas_call(
        _linear_kernel,
        out_shape=jax.ShapeDtypeStruct((B, C), out_dtype),
        grid_spec=pltpu.PrefetchScalarGridSpec(
            num_scalar_prefetch=0,
            grid=grid,
            in_specs=[
                pl.BlockSpec((tm_eff, tk_eff), lambda i, j, k: (i, k)),  # x
                pl.BlockSpec((tn_eff, tk_eff), lambda i, j, k: (j, k)),  # W [C, K]
                pl.BlockSpec((1, tn_eff), lambda i, j, k: (0, j)),       # bias
            ],
            out_specs=pl.BlockSpec((tm_eff, tn_eff), lambda i, j, k: (i, j)),
            scratch_shapes=[pltpu.VMEM((tm_eff, tn_eff), jnp.float32)],
        ),
        compiler_params=pltpu.CompilerParams(
            dimension_semantics=("parallel", "parallel", "arbitrary"),
            vmem_limit_bytes=int(vmem_limit)),
    )(x_c, w_c, b2)

    return out


if __name__ == "__main__":
    d_model = 32
    num_classes = 2
    batch = 8

    key = jax.random.PRNGKey(0)
    kx, kw, kb = jax.random.split(key, 3)

    # Deterministic synthetic parameters (PyTorch Linear default-init ranges).
    bound = 1.0 / math.sqrt(d_model)
    weight = jax.random.uniform(kw, (num_classes, d_model), jnp.float32,
                                minval=-bound, maxval=bound)
    bias = jax.random.uniform(kb, (num_classes,), jnp.float32,
                              minval=-bound, maxval=bound)
    x = jax.random.normal(kx, (batch, d_model), jnp.float32)

    out = classifier_forward(x, weight, bias)
    out = jax.block_until_ready(out)

    # Reference in plain JAX (f32).  The kernel uses bf16 MXU operands with f32
    # accumulation, so the tolerance is relaxed accordingly.
    ref = x @ weight.T + bias
    assert out.shape == (batch, num_classes)
    assert jnp.allclose(out, ref, atol=5e-2, rtol=5e-2), (out, ref)

    print("KERNEL_OK")
</pallas_src>

<mosaic_0001>
module attributes {stable_mosaic.version = 11 : i64} {
  func.func @_linear_kernel(%arg0: i32, %arg1: i32, %arg2: i32, %arg3: memref<8x32xbf16, #tpu.memory_space<vmem>>, %arg4: memref<2x32xbf16, #tpu.memory_space<vmem>>, %arg5: memref<1x2xf32, #tpu.memory_space<vmem>>, %arg6: memref<8x2xf32, #tpu.memory_space<vmem>>, %arg7: memref<8x2xf32, #tpu.memory_space<vmem>>) attributes {dimension_semantics = [#tpu.dimension_semantics<parallel>, #tpu.dimension_semantics<parallel>, #tpu.dimension_semantics<arbitrary>], iteration_bounds = array<i64: 1, 1, 1>, scalar_prefetch = 0 : i64, scratch_operands = 1 : i64, tpu.core_type = #tpu.core_type<tc>, window_params = [{transform_indices = @transform_0, window_bounds = array<i64: 8, 32>}, {transform_indices = @transform_1, window_bounds = array<i64: 2, 32>}, {transform_indices = @transform_2, window_bounds = array<i64: 1, 2>}, {transform_indices = @transform_3, window_bounds = array<i64: 8, 2>}]} {
    %c0_i32 = arith.constant 0 : i32
    %0 = arith.cmpi eq, %arg2, %c0_i32 : i32
    %1 = arith.extui %0 : i1 to i32
    %c0_i32_0 = arith.constant 0 : i32
    %2 = arith.cmpi ne, %1, %c0_i32_0 : i32
    scf.if %2 {
      %c0_10 = arith.constant 0 : index
      %c0_11 = arith.constant 0 : index
      %12 = vector.load %arg5[%c0_10, %c0_11] : memref<1x2xf32, #tpu.memory_space<vmem>>, vector<1x2xf32>
      %13 = vector.shape_cast %12 : vector<1x2xf32> to vector<1x2xf32>
      %14 = vector.broadcast %13 : vector<1x2xf32> to vector<8x2xf32>
      %c0_12 = arith.constant 0 : index
      %c0_13 = arith.constant 0 : index
      %15 = vector.load %arg7[%c0_12, %c0_13] : memref<8x2xf32, #tpu.memory_space<vmem>>, vector<8x2xf32>
      tpu.vector_store %arg7[%c0_12, %c0_13], %14 {strides = array<i32>} : memref<8x2xf32, #tpu.memory_space<vmem>>, vector<8x2xf32>,
    } else {
    }
    %c0 = arith.constant 0 : index
    %c0_1 = arith.constant 0 : index
    %3 = vector.load %arg7[%c0, %c0_1] : memref<8x2xf32, #tpu.memory_space<vmem>>, vector<8x2xf32>
    %c0_2 = arith.constant 0 : index
    %c0_3 = arith.constant 0 : index
    %4 = vector.load %arg3[%c0_2, %c0_3] : memref<8x32xbf16, #tpu.memory_space<vmem>>, vector<8x32xbf16>
    %c0_4 = arith.constant 0 : index
    %c0_5 = arith.constant 0 : index
    %5 = vector.load %arg4[%c0_4, %c0_5] : memref<2x32xbf16, #tpu.memory_space<vmem>>, vector<2x32xbf16>
    %cst = arith.constant dense<0.000000e+00> : vector<8x2xf32>
    %6 = tpu.matmul %4, %5, %cst {dimension_numbers = #tpu.dot_dimension_numbers<[1], [1], [0], [0], [0, 0, 1, 0], [], []>} : vector<8x32xbf16>, vector<2x32xbf16>, vector<8x2xf32> -> vector<8x2xf32>
    %7 = arith.addf %3, %6 : vector<8x2xf32>
    %c0_6 = arith.constant 0 : index
    %c0_7 = arith.constant 0 : index
    %8 = vector.load %arg7[%c0_6, %c0_7] : memref<8x2xf32, #tpu.memory_space<vmem>>, vector<8x2xf32>
    tpu.vector_store %arg7[%c0_6, %c0_7], %7 {strides = array<i32>} : memref<8x2xf32, #tpu.memory_space<vmem>>, vector<8x2xf32>,
    %c0_i32_8 = arith.constant 0 : i32
    %9 = arith.cmpi eq, %arg2, %c0_i32_8 : i32
    %10 = arith.extui %9 : i1 to i32
    %c0_i32_9 = arith.constant 0 : i32
    %11 = arith.cmpi ne, %10, %c0_i32_9 : i32
    scf.if %11 {
      %c0_10 = arith.constant 0 : index
      %c0_11 = arith.constant 0 : index
      %12 = vector.load %arg7[%c0_10, %c0_11] : memref<8x2xf32, #tpu.memory_space<vmem>>, vector<8x2xf32>
      %c0_12 = arith.constant 0 : index
      %c0_13 = arith.constant 0 : index
      %13 = vector.load %arg6[%c0_12, %c0_13] : memref<8x2xf32, #tpu.memory_space<vmem>>, vector<8x2xf32>
      tpu.vector_store %arg6[%c0_12, %c0_13], %12 {strides = array<i32>} : memref<8x2xf32, #tpu.memory_space<vmem>>, vector<8x2xf32>,
    } else {
    }
    return
  }
  func.func @transform_0(%arg0: i32, %arg1: i32, %arg2: i32) -> (i32, i32) {
    %c0_i32 = arith.constant 0 : i32
    return %arg0, %arg2 : i32, i32
  }
  func.func @transform_1(%arg0: i32, %arg1: i32, %arg2: i32) -> (i32, i32) {
    %c0_i32 = arith.constant 0 : i32
    return %arg1, %arg2 : i32, i32
  }
  func.func @transform_2(%arg0: i32, %arg1: i32, %arg2: i32) -> (i32, i32) {
    %c0_i32 = arith.constant 0 : i32
    %c0_i32_0 = arith.constant 0 : i32
    return %c0_i32, %arg1 : i32, i32
  }
  func.func @transform_3(%arg0: i32, %arg1: i32, %arg2: i32) -> (i32, i32) {
    %c0_i32 = arith.constant 0 : i32
    return %arg0, %arg1 : i32, i32
  }
}

</mosaic_0001>

<bundles_post_ra>
// kernel: tpu_custom_call.1
= control target key start
LH: loop header
LB: loop body
LE: loop exit
PB: predicated region body
PF: predicated region fallthrough
CT: control target
= control target key end

     0   :  { %8 = vsyncpa [#allocation4], 0  ;;  %s180_s0 = inlined_call_operand.hbm [shape: bf16[8,32], index: 0, kind: input, shape index: {}]   ;;  %s181_s1 = inlined_call_operand.hbm [shape: bf16[2,32], index: 1, kind: input, shape index: {}]   ;;  %s182_s2 = inlined_call_operand.vmem [shape: f32[1,2], index: 2, kind: input, shape index: {}]   ;;  %s183_s3 = inlined_call_operand.vmem [shape: f32[8,2], index: 3, kind: output, shape index: {}]  }
   0x1   :  { %s15_s14 = sshll.u32 %s180_s0, 4  ;;  %s16_s14 = int_to_ptr.hbm [resolvable:$true] %s15_s14 }
   0x2   :  { %9 = vsyncpa [#allocation6], 0  ;;  %s146_s15 = smov [#allocation3]   ;;  %s26_s19 = sshll.u32 %s181_s1, 4  ;;  %s27_s19 = int_to_ptr.hbm [resolvable:$true] %s26_s19 }
   0x3   :  { %s17_s16 = sshll.u32 %s146_s15, 4  ;;  %s147_s20 = smov [#allocation5]   ;;  %s18_s16 = int_to_ptr.vmem [resolvable:$true] %s17_s16 }
   0x4   :  { %20 = dma.hbm_to_vmem [thread:$0]  %s16_s14, 64, %s18_s16, [#allocation4]  }
   0x5   :  { %s28_s21 = sshll.u32 %s147_s20, 4  ;;  %s29_s21 = int_to_ptr.vmem [resolvable:$true] %s28_s21 }
   0x6   :  { %31 = dma.hbm_to_vmem [thread:$0]  %s27_s19, 16, %s29_s21, [#allocation6]  }
   0x7   :  { %142 = dma.done.wait [#allocation4], 64  }
   0x8   :  { %143 = vsyncadd [#allocation4], 4294967232 }
   0x9   :  { %144 = dma.done.wait [#allocation6], 16  }
   0xa   :  { %145 = vsyncadd [#allocation6], 4294967280  ;;  %vm56_vm0 = vcmask 261120   ;;  %v55_v0 = vld [vmem:[#allocation5] sm:$0x1]  ;;  %vm51_vm1 = vcmask 15360  }
   0xb   :  { %v61_v1 = vsel %vm56_vm0, %v55_v0, 0  ;;  %v93_v2 = vld [vmem:[%s182_s2] ss:$0 sm:$0xff]  ;;  %v54_v3 = vld [vmem:[#allocation3] sm:$0xf] }
   0xc   :  { %70 = vmatpush.bf16.xpose.msra.mxu0 %v61_v1  ;;  %52 = vst.msk [vmem:[#allocation2] sm:$0xff] %vm51_vm1, %v93_v2 }
  0x13   :  { %90 = vmatmul.msk.bf16.vlgmr.msra.gmra.mxu0 %vm56_vm0, %v54_v3  ;;  %v53_v4 = vld [vmem:[#allocation2] sm:$0xff] }
  0x90   :  { %v72_v5 = vpop.f32.mrf.mxu0 }
  0x91   :  { %v76_v6 = vadd.f32 %v72_v5, %v53_v4 }
  0x93   :  { %78 = vst.msk [vmem:[#allocation2] sm:$0xff] %vm51_vm1, %v76_v6 }
  0x98   :  { %v74_v7 = vpop.f32.mrf.mxu0 }
  0x9a   :  { %v82_v8 = vld [vmem:[#allocation2] sm:$0xff] }
  0x9b   :  { %83 = vst.msk [vmem:[%s183_s3] sm:$0xff] %vm51_vm1, %v82_v8 }
  0x9c   :  { %88 = vsyncpa [#allocation4], 1 }
  0x9d   :  { %89 = vsyncpa [#allocation6], 1 }

</bundles_post_ra>
